<compile_context>
chip_gen: v5e
topology: v5e:2x2
jax: 0.10.0
libtpu: 0.0.40
codegen_flags: <defaults>
</compile_context>

<pallas_src>
import numpy as np
import jax
import jax.numpy as jnp
from jax import lax
from jax.experimental import pallas as pl
from jax.experimental.pallas import tpu as pltpu

GAMMA = 2.2
SSIM_WIN = 11
SSIM_SIGMA = 1.5
SSIM_C1 = 0.01 ** 2
SSIM_C2 = 0.03 ** 2

# Reduction tiling: 1024 rows x 128 lanes (512 KiB/block) -> ~2 MiB double-buffered
# for two inputs; near the HBM roofline plateau and fewer fixed-cost grid steps.
_REDUCE_TILE_ROWS = 1024
_REDUCE_CORES = 2                      # leading 'parallel' axis (megacore split on v7x)
_REDUCE_VMEM_LIMIT = 32 * 1024 * 1024

# SSIM channel batching: small (<=4), honest VMEM budget, nblk >= 2 for megacore.
_SSIM_CB_MAX = 4
_SSIM_VMEM_BUDGET = 8 * 1024 * 1024
_SSIM_VMEM_LIMIT = 32 * 1024 * 1024
_SSIM_MATMUL_BF16 = True               # bf16 MXU operands (f32 accumulate); ~1e-3 SSIM tol


# ----------------------------------------------------------------------------
# helpers
# ----------------------------------------------------------------------------
def _reduce_geom(n):
    """Rows-of-128 geometry; rows padded to exactly _REDUCE_CORES * nblk * tile so the
    kernels need no tail mask (zero padding is neutral for every accumulated sum)."""
    rows = -(-n // 128)
    rows = -(-rows // 8) * 8
    tile = min(_REDUCE_TILE_ROWS, rows)
    total_blocks = -(-rows // tile)
    nblk = -(-total_blocks // _REDUCE_CORES)
    rows_pad = _REDUCE_CORES * nblk * tile
    return tile, nblk, rows_pad


def _as_rows128(x, rows_pad):
    """View x as (rows_pad, 128) f32, zero-padded to the reduction geometry."""
    n = int(np.prod(x.shape))
    flat = x.reshape(-1).astype(jnp.float32)
    pad = rows_pad * 128 - n
    if pad:
        flat = jnp.pad(flat, (0, pad))
    return flat.reshape(rows_pad, 128)


def _gaussian_1d(win, sigma):
    ax = np.arange(win, dtype=np.float64) - (win - 1) / 2.0
    g = np.exp(-(ax ** 2) / (2.0 * sigma ** 2))
    return (g / g.sum()).astype(np.float32)


def _ssim_blur_matrices(H, W):
    """Banded matrices so that blur(X) = A @ X @ B equals the 11x11 Gaussian window."""
    g = _gaussian_1d(SSIM_WIN, SSIM_SIGMA)
    Hv, Wv = H - SSIM_WIN + 1, W - SSIM_WIN + 1
    A = np.zeros((Hv, H), np.float32)
    for v in range(Hv):
        A[v, v:v + SSIM_WIN] = g
    B = np.zeros((W, Wv), np.float32)
    for u in range(Wv):
        B[u:u + SSIM_WIN, u] = g
    return A, B, Hv, Wv


def _psnr_from_mse(mse):
    return 10.0 * jnp.log10(1.0 / jnp.maximum(mse, 1e-12))


# ----------------------------------------------------------------------------
# kernel 1: fused global statistics (tiled, pipelined, 2-core split)
#   sums[0..5] = sum(p), sum(g), sum(p*p), sum(g*g), sum(p*g), sum((p-g)^2)
# ----------------------------------------------------------------------------
def _pair_sums_2d(p2d, g2d, tile, nblk):
    def kernel(p_ref, g_ref, out_ref):
        i = pl.program_id(1)

        @pl.when(i == 0)
        def _():
            out_ref[...] = jnp.zeros_like(out_ref)

        p = p_ref[...]
        g = g_ref[...]
        d = p - g

        def part(v):  # (tile,128) -> (8,128), pure vreg adds
            return jnp.sum(v.reshape(-1, 8, 128), axis=0)

        out_ref[0] += part(p)
        out_ref[1] += part(g)
        out_ref[2] += part(p * p)
        out_ref[3] += part(g * g)
        out_ref[4] += part(p * g)
        # Direct residual accumulator kept (no spp - 2*spg + sgg shortcut) to avoid
        # catastrophic cancellation at high PSNR with large element counts.
        out_ref[5] += part(d * d)

    partial = pl.pallas_call(
        kernel,
        out_shape=jax.ShapeDtypeStruct((_REDUCE_CORES, 6, 8, 128), jnp.float32),
        grid=(_REDUCE_CORES, nblk),
        in_specs=[pl.BlockSpec((tile, 128), lambda c, i: (c * nblk + i, 0)),
                  pl.BlockSpec((tile, 128), lambda c, i: (c * nblk + i, 0))],
        out_specs=pl.BlockSpec((None, 6, 8, 128), lambda c, i: (c, 0, 0, 0)),
        compiler_params=pltpu.CompilerParams(
            dimension_semantics=("parallel", "arbitrary"),
            vmem_limit_bytes=_REDUCE_VMEM_LIMIT),
    )(p2d, g2d)
    # Cross-lane + cross-core combine happens once, outside the kernel.
    return jnp.sum(partial, axis=(0, 2, 3))   # (6,)


def _pair_sums(pred, gt):
    n = int(np.prod(pred.shape))
    tile, nblk, rows_pad = _reduce_geom(n)
    p2d = _as_rows128(pred, rows_pad)
    g2d = _as_rows128(gt, rows_pad)
    sums = _pair_sums_2d(p2d, g2d, tile, nblk)
    return sums, n, p2d, g2d, tile, nblk


# ----------------------------------------------------------------------------
# kernel 2: gamma-corrected squared-error reduction (tiled, pipelined, 2-core split)
# TODO(synk): this second HBM pass could be fused into kernel 1 by accumulating
#             sum(p^(2/g)), sum(g^(2/g)), sum((p*g)^(1/g)) — only exact when the
#             clip(p*scale, 0, 1) is inactive, so the exact clipped form is kept.
# ----------------------------------------------------------------------------
def _gamma_sq_sum(scale, p2d, g2d, tile, nblk):
    inv_g = float(1.0 / GAMMA)

    def kernel(scale_ref, p_ref, g_ref, out_ref):
        i = pl.program_id(1)

        @pl.when(i == 0)
        def _():
            out_ref[...] = jnp.zeros_like(out_ref)

        s = scale_ref[0]
        p = jnp.clip(p_ref[...] * s, 0.0, 1.0)
        g = g_ref[...]   # gt documented in [0,1]: redundant clip removed
        d = jnp.power(p, jnp.float32(inv_g)) - jnp.power(g, jnp.float32(inv_g))
        out_ref[...] += jnp.sum((d * d).reshape(-1, 8, 128), axis=0)

    partial = pl.pallas_call(
        kernel,
        out_shape=jax.ShapeDtypeStruct((_REDUCE_CORES, 8, 128), jnp.float32),
        grid=(_REDUCE_CORES, nblk),
        in_specs=[pl.BlockSpec(memory_space=pltpu.SMEM),
                  pl.BlockSpec((tile, 128), lambda c, i: (c * nblk + i, 0)),
                  pl.BlockSpec((tile, 128), lambda c, i: (c * nblk + i, 0))],
        out_specs=pl.BlockSpec((None, 8, 128), lambda c, i: (c, 0, 0)),
        compiler_params=pltpu.CompilerParams(
            dimension_semantics=("parallel", "arbitrary"),
            vmem_limit_bytes=_REDUCE_VMEM_LIMIT),
    )(scale.reshape(1).astype(jnp.float32), p2d, g2d)
    return jnp.sum(partial)


# ----------------------------------------------------------------------------
# kernel 3: SSIM via MXU matmul blurs, channel-batched grid
# ----------------------------------------------------------------------------
def ssim_metric(pred, gt):
    N, C, H, W = pred.shape
    NC = N * C
    assert H >= SSIM_WIN and W >= SSIM_WIN, "image smaller than SSIM window"
    A_np, B_np, Hv, Wv = _ssim_blur_matrices(H, W)
    mm_dtype = jnp.bfloat16 if _SSIM_MATMUL_BF16 else jnp.float32
    mm_isz = 2 if _SSIM_MATMUL_BF16 else 4
    A = jnp.asarray(A_np).astype(mm_dtype)    # (Hv, H)
    Bm = jnp.asarray(B_np).astype(mm_dtype)   # (W, Wv)

    x = pred.reshape(NC, H, W).astype(jnp.float32)
    y = gt.reshape(NC, H, W).astype(jnp.float32)

    # Honest VMEM budget: x/y double buffers + A/B double buffers + output block
    # + live per-channel intermediates (the fori_loop bounds them to one channel).
    per_chan_in = H * W * 4
    a_b_bytes = 2 * (Hv * H + W * Wv) * mm_isz
    live_bytes = 5 * H * W * (4 + mm_isz) + 5 * H * Wv * (4 + mm_isz) + 12 * Hv * Wv * 4
    fixed = a_b_bytes + 2 * 8 * 128 * 4 + live_bytes
    cb_fit = max(1, int((_SSIM_VMEM_BUDGET - fixed) // (4 * per_chan_in)))
    Cb = max(1, min(NC, _SSIM_CB_MAX, cb_fit))
    if NC >= 2:
        Cb = min(Cb, -(-NC // 2))   # keep nblk >= 2 so the 'parallel' axis splits (v7x)
    nblk = -(-NC // Cb)
    need_mask = (NC % Cb) != 0
    # TODO(synk): for very large spatial extents, tile spatially with a (SSIM_WIN-1)
    #             halo / narrow band sub-blocks of A,B to avoid the dense-banded
    #             (H+W)/22 FLOP blow-up and bound the per-block VMEM footprint.

    def kernel(x_ref, y_ref, a_ref, b_ref, out_ref):
        a = a_ref[...]             # (Hv, H)  mm_dtype
        b = b_ref[...]             # (W, Wv)  mm_dtype
        base = pl.program_id(0) * Cb

        def body(c, total):        # one channel per iteration -> bounded live ranges
            xc = x_ref[c]          # (H, W) f32
            yc = y_ref[c]
            # Batch the column (B-side) blur of the 5 maps into ONE tall MXU matmul;
            # the row (A-side) blur stays as 5 small matmuls on static slices.
            s = jnp.concatenate([xc, yc, xc * xc, yc * yc, xc * yc], axis=0)  # (5H, W)
            p = jnp.dot(s.astype(mm_dtype), b,
                        preferred_element_type=jnp.float32)                  # (5H, Wv)
            p = p.astype(mm_dtype)

            def lblur(k):          # (Hv, H) @ (H, Wv) -> (Hv, Wv)
                return jnp.dot(a, p[k * H:(k + 1) * H, :],
                               preferred_element_type=jnp.float32)

            mu_x, mu_y, exx, eyy, exy = [lblur(k) for k in range(5)]
            sxx = exx - mu_x * mu_x
            syy = eyy - mu_y * mu_y
            sxy = exy - mu_x * mu_y
            num = (2.0 * mu_x * mu_y + SSIM_C1) * (2.0 * sxy + SSIM_C2)
            den = (mu_x * mu_x + mu_y * mu_y + SSIM_C1) * (sxx + syy + SSIM_C2)
            ch_sum = jnp.sum(num * pl.reciprocal(den, approx=True))
            if need_mask:
                ch_sum = jnp.where(base + c < NC, ch_sum, 0.0)
            return total + ch_sum

        total = lax.fori_loop(0, Cb, body, jnp.float32(0.0))
        out_ref[...] = jnp.full((1, 8, 128), total, jnp.float32)

    partial = pl.pallas_call(
        kernel,
        out_shape=jax.ShapeDtypeStruct((nblk, 8, 128), jnp.float32),
        grid=(nblk,),
        in_specs=[pl.BlockSpec((Cb, H, W), lambda i: (i, 0, 0)),
                  pl.BlockSpec((Cb, H, W), lambda i: (i, 0, 0)),
                  pl.BlockSpec((Hv, H), lambda i: (0, 0)),
                  pl.BlockSpec((W, Wv), lambda i: (0, 0))],
        out_specs=pl.BlockSpec((1, 8, 128), lambda i: (i, 0, 0)),
        compiler_params=pltpu.CompilerParams(
            dimension_semantics=("parallel",),
            vmem_limit_bytes=_SSIM_VMEM_LIMIT),
    )(x, y, A, Bm)

    return jnp.sum(partial[:, 0, 0]) / jnp.float32(NC * Hv * Wv)


# ----------------------------------------------------------------------------
# metric wrappers (scalar glue in plain JAX); sums shared across the PSNR family
# ----------------------------------------------------------------------------
def _psnr_from_sums(sums, n):
    return _psnr_from_mse(sums[5] / n)


def _linear_psnr_from_sums(sums, n):
    sp, sg, spp, sgg, spg = sums[0], sums[1], sums[2], sums[3], sums[4]
    scale = sg / jnp.maximum(sp, 1e-8)
    # TODO(synk): compensated accumulation if >~50 dB at >~10M elements matters.
    mse = (scale * scale * spp - 2.0 * scale * spg + sgg) / n
    return _psnr_from_mse(mse)


def _gamma_psnr_from_sums(sums, n, p2d, g2d, tile, nblk):
    scale = sums[1] / jnp.maximum(sums[0], 1e-8)
    sq = _gamma_sq_sum(scale, p2d, g2d, tile, nblk)
    return _psnr_from_mse(sq / n)


def psnr_metric(pred, gt):
    sums, n, *_ = _pair_sums(pred, gt)
    return _psnr_from_sums(sums, n)


def normalized_psnr_linear(pred, gt):
    sums, n, *_ = _pair_sums(pred, gt)
    return _linear_psnr_from_sums(sums, n)


def normalized_psnr_gamma(pred, gt):
    sums, n, p2d, g2d, tile, nblk = _pair_sums(pred, gt)
    return _gamma_psnr_from_sums(sums, n, p2d, g2d, tile, nblk)


_METRICS = {
    'PSNR': psnr_metric,
    'PSNR-Linear_N': normalized_psnr_linear,
    'PSNR-Gamma_N': normalized_psnr_gamma,
    'SSIM': ssim_metric,
}

# batch keys standing in for ELB.PRD / ELB.NL
PRD = 'PRD'
NL = 'NL'


class MixedMetric:
    """JAX/Pallas equivalent of the PyTorch MixedMetric container.

    The fused pair-sums pass (and the padded 2D views) is computed once per call
    and shared by all PSNR-family metrics; the whole metric list runs under one
    jax.jit program so the pallas_calls and scalar glue dispatch together.
    """

    def __init__(self, names):
        for nm in names:
            if nm not in _METRICS:
                raise ValueError(f'Unknown loss: {nm}')
        self.metric = list(names)
        self.eval = [_METRICS[nm] for nm in names]
        self._compute = jax.jit(self._compute_all)

    def _compute_all(self, pred, gt):
        shared = None  # (sums, n, p2d, g2d, tile, nblk), computed lazily, reused
        vals = []
        for m in self.metric:
            if m == 'SSIM':
                vals.append(ssim_metric(pred, gt))
            else:
                if shared is None:
                    shared = _pair_sums(pred, gt)
                sums, n, p2d, g2d, tile, nblk = shared
                if m == 'PSNR':
                    vals.append(_psnr_from_sums(sums, n))
                elif m == 'PSNR-Linear_N':
                    vals.append(_linear_psnr_from_sums(sums, n))
                else:  # 'PSNR-Gamma_N'
                    vals.append(_gamma_psnr_from_sums(sums, n, p2d, g2d, tile, nblk))
        return tuple(vals)

    def __call__(self, batch):
        vals = self._compute(batch[PRD], batch[NL])
        return list(zip(self.metric, vals))


# ----------------------------------------------------------------------------
if __name__ == "__main__":
    key = jax.random.PRNGKey(0)
    k1, k2 = jax.random.split(key)
    # batch=2, channels=4, spatial=16x16, values in [0, 1]
    pred = jax.random.uniform(k1, (2, 4, 16, 16), dtype=jnp.float32)
    nl = jax.random.uniform(k2, (2, 4, 16, 16), dtype=jnp.float32)
    batch = {PRD: pred, NL: nl}

    mm = MixedMetric(['PSNR', 'PSNR-Linear_N', 'PSNR-Gamma_N', 'SSIM'])
    results = mm(batch)
    for _, val in results:
        jax.block_until_ready(val)
    print("KERNEL_OK")
</pallas_src>

<mosaic_0001>
module attributes {stable_mosaic.version = 11 : i64} {
  func.func @kernel(%arg0: i32, %arg1: i32, %arg2: memref<16x128xf32, #tpu.memory_space<vmem>>, %arg3: memref<16x128xf32, #tpu.memory_space<vmem>>, %arg4: memref<1x6x8x128xf32, #tpu.memory_space<vmem>>) attributes {dimension_semantics = [#tpu.dimension_semantics<parallel>, #tpu.dimension_semantics<arbitrary>], iteration_bounds = array<i64: 2, 1>, scalar_prefetch = 0 : i64, scratch_operands = 0 : i64, tpu.core_type = #tpu.core_type<tc>, window_params = [{transform_indices = @transform_0, window_bounds = array<i64: 16, 128>}, {transform_indices = @transform_1, window_bounds = array<i64: 16, 128>}, {transform_indices = @transform_2, window_bounds = array<i64: 1, 6, 8, 128>}]} {
    %c0_i32 = arith.constant 0 : i32
    %0 = arith.cmpi eq, %arg1, %c0_i32 : i32
    %1 = arith.extui %0 : i1 to i32
    %c0_i32_0 = arith.constant 0 : i32
    %2 = arith.cmpi ne, %1, %c0_i32_0 : i32
    scf.if %2 {
      %cst_52 = arith.constant 0.000000e+00 : f32
      %58 = vector.broadcast %cst_52 : f32 to vector<6x8x128xf32>
      %c0_53 = arith.constant 0 : index
      %c0_54 = arith.constant 0 : index
      %c0_55 = arith.constant 0 : index
      %c0_56 = arith.constant 0 : index
      %59 = vector.load %arg4[%c0_53, %c0_54, %c0_55, %c0_56] : memref<1x6x8x128xf32, #tpu.memory_space<vmem>>, vector<1x6x8x128xf32>
      %60 = vector.shape_cast %59 : vector<1x6x8x128xf32> to vector<6x8x128xf32>
      %61 = vector.shape_cast %58 : vector<6x8x128xf32> to vector<1x6x8x128xf32>
      tpu.vector_store %arg4[%c0_53, %c0_54, %c0_55, %c0_56], %61 {strides = array<i32>} : memref<1x6x8x128xf32, #tpu.memory_space<vmem>>, vector<1x6x8x128xf32>,
    } else {
    }
    %c0 = arith.constant 0 : index
    %c0_1 = arith.constant 0 : index
    %3 = vector.load %arg2[%c0, %c0_1] : memref<16x128xf32, #tpu.memory_space<vmem>>, vector<16x128xf32>
    %c0_2 = arith.constant 0 : index
    %c0_3 = arith.constant 0 : index
    %4 = vector.load %arg3[%c0_2, %c0_3] : memref<16x128xf32, #tpu.memory_space<vmem>>, vector<16x128xf32>
    %5 = arith.subf %3, %4 : vector<16x128xf32>
    %c0_4 = arith.constant 0 : index
    %c0_5 = arith.constant 0 : index
    %c0_6 = arith.constant 0 : index
    %c0_7 = arith.constant 0 : index
    %6 = vector.load %arg4[%c0_4, %c0_5, %c0_6, %c0_7] : memref<1x6x8x128xf32, #tpu.memory_space<vmem>>, vector<1x1x8x128xf32>
    %7 = vector.shape_cast %6 : vector<1x1x8x128xf32> to vector<8x128xf32>
    %8 = vector.shape_cast %3 : vector<16x128xf32> to vector<2x8x128xf32>
    %cst = arith.constant dense<0.000000e+00> : vector<8x128xf32>
    %9 = vector.multi_reduction <add>, %8, %cst [0] : vector<2x8x128xf32> to vector<8x128xf32>
    %10 = arith.addf %7, %9 : vector<8x128xf32>
    %c0_8 = arith.constant 0 : index
    %c0_9 = arith.constant 0 : index
    %c0_10 = arith.constant 0 : index
    %c0_11 = arith.constant 0 : index
    %11 = vector.load %arg4[%c0_8, %c0_9, %c0_10, %c0_11] : memref<1x6x8x128xf32, #tpu.memory_space<vmem>>, vector<1x1x8x128xf32>
    %12 = vector.shape_cast %11 : vector<1x1x8x128xf32> to vector<8x128xf32>
    %13 = vector.shape_cast %10 : vector<8x128xf32> to vector<1x1x8x128xf32>
    tpu.vector_store %arg4[%c0_8, %c0_9, %c0_10, %c0_11], %13 {strides = array<i32>} : memref<1x6x8x128xf32, #tpu.memory_space<vmem>>, vector<1x1x8x128xf32>,
    %c0_12 = arith.constant 0 : index
    %c1 = arith.constant 1 : index
    %c0_13 = arith.constant 0 : index
    %c0_14 = arith.constant 0 : index
    %14 = vector.load %arg4[%c0_12, %c1, %c0_13, %c0_14] : memref<1x6x8x128xf32, #tpu.memory_space<vmem>>, vector<1x1x8x128xf32>
    %15 = vector.shape_cast %14 : vector<1x1x8x128xf32> to vector<8x128xf32>
    %16 = vector.shape_cast %4 : vector<16x128xf32> to vector<2x8x128xf32>
    %cst_15 = arith.constant dense<0.000000e+00> : vector<8x128xf32>
    %17 = vector.multi_reduction <add>, %16, %cst_15 [0] : vector<2x8x128xf32> to vector<8x128xf32>
    %18 = arith.addf %15, %17 : vector<8x128xf32>
    %c0_16 = arith.constant 0 : index
    %c1_17 = arith.constant 1 : index
    %c0_18 = arith.constant 0 : index
    %c0_19 = arith.constant 0 : index
    %19 = vector.load %arg4[%c0_16, %c1_17, %c0_18, %c0_19] : memref<1x6x8x128xf32, #tpu.memory_space<vmem>>, vector<1x1x8x128xf32>
    %20 = vector.shape_cast %19 : vector<1x1x8x128xf32> to vector<8x128xf32>
    %21 = vector.shape_cast %18 : vector<8x128xf32> to vector<1x1x8x128xf32>
    tpu.vector_store %arg4[%c0_16, %c1_17, %c0_18, %c0_19], %21 {strides = array<i32>} : memref<1x6x8x128xf32, #tpu.memory_space<vmem>>, vector<1x1x8x128xf32>,
    %c0_20 = arith.constant 0 : index
    %c2 = arith.constant 2 : index
    %c0_21 = arith.constant 0 : index
    %c0_22 = arith.constant 0 : index
    %22 = vector.load %arg4[%c0_20, %c2, %c0_21, %c0_22] : memref<1x6x8x128xf32, #tpu.memory_space<vmem>>, vector<1x1x8x128xf32>
    %23 = vector.shape_cast %22 : vector<1x1x8x128xf32> to vector<8x128xf32>
    %24 = arith.mulf %3, %3 : vector<16x128xf32>
    %25 = vector.shape_cast %24 : vector<16x128xf32> to vector<2x8x128xf32>
    %cst_23 = arith.constant dense<0.000000e+00> : vector<8x128xf32>
    %26 = vector.multi_reduction <add>, %25, %cst_23 [0] : vector<2x8x128xf32> to vector<8x128xf32>
    %27 = arith.addf %23, %26 : vector<8x128xf32>
    %c0_24 = arith.constant 0 : index
    %c2_25 = arith.constant 2 : index
    %c0_26 = arith.constant 0 : index
    %c0_27 = arith.constant 0 : index
    %28 = vector.load %arg4[%c0_24, %c2_25, %c0_26, %c0_27] : memref<1x6x8x128xf32, #tpu.memory_space<vmem>>, vector<1x1x8x128xf32>
    %29 = vector.shape_cast %28 : vector<1x1x8x128xf32> to vector<8x128xf32>
    %30 = vector.shape_cast %27 : vector<8x128xf32> to vector<1x1x8x128xf32>
    tpu.vector_store %arg4[%c0_24, %c2_25, %c0_26, %c0_27], %30 {strides = array<i32>} : memref<1x6x8x128xf32, #tpu.memory_space<vmem>>, vector<1x1x8x128xf32>,
    %c0_28 = arith.constant 0 : index
    %c3 = arith.constant 3 : index
    %c0_29 = arith.constant 0 : index
    %c0_30 = arith.constant 0 : index
    %31 = vector.load %arg4[%c0_28, %c3, %c0_29, %c0_30] : memref<1x6x8x128xf32, #tpu.memory_space<vmem>>, vector<1x1x8x128xf32>
    %32 = vector.shape_cast %31 : vector<1x1x8x128xf32> to vector<8x128xf32>
    %33 = arith.mulf %4, %4 : vector<16x128xf32>
    %34 = vector.shape_cast %33 : vector<16x128xf32> to vector<2x8x128xf32>
    %cst_31 = arith.constant dense<0.000000e+00> : vector<8x128xf32>
    %35 = vector.multi_reduction <add>, %34, %cst_31 [0] : vector<2x8x128xf32> to vector<8x128xf32>
    %36 = arith.addf %32, %35 : vector<8x128xf32>
    %c0_32 = arith.constant 0 : index
    %c3_33 = arith.constant 3 : index
    %c0_34 = arith.constant 0 : index
    %c0_35 = arith.constant 0 : index
    %37 = vector.load %arg4[%c0_32, %c3_33, %c0_34, %c0_35] : memref<1x6x8x128xf32, #tpu.memory_space<vmem>>, vector<1x1x8x128xf32>
    %38 = vector.shape_cast %37 : vector<1x1x8x128xf32> to vector<8x128xf32>
    %39 = vector.shape_cast %36 : vector<8x128xf32> to vector<1x1x8x128xf32>
    tpu.vector_store %arg4[%c0_32, %c3_33, %c0_34, %c0_35], %39 {strides = array<i32>} : memref<1x6x8x128xf32, #tpu.memory_space<vmem>>, vector<1x1x8x128xf32>,
    %c0_36 = arith.constant 0 : index
    %c4 = arith.constant 4 : index
    %c0_37 = arith.constant 0 : index
    %c0_38 = arith.constant 0 : index
    %40 = vector.load %arg4[%c0_36, %c4, %c0_37, %c0_38] : memref<1x6x8x128xf32, #tpu.memory_space<vmem>>, vector<1x1x8x128xf32>
    %41 = vector.shape_cast %40 : vector<1x1x8x128xf32> to vector<8x128xf32>
    %42 = arith.mulf %3, %4 : vector<16x128xf32>
    %43 = vector.shape_cast %42 : vector<16x128xf32> to vector<2x8x128xf32>
    %cst_39 = arith.constant dense<0.000000e+00> : vector<8x128xf32>
    %44 = vector.multi_reduction <add>, %43, %cst_39 [0] : vector<2x8x128xf32> to vector<8x128xf32>
    %45 = arith.addf %41, %44 : vector<8x128xf32>
    %c0_40 = arith.constant 0 : index
    %c4_41 = arith.constant 4 : index
    %c0_42 = arith.constant 0 : index
    %c0_43 = arith.constant 0 : index
    %46 = vector.load %arg4[%c0_40, %c4_41, %c0_42, %c0_43] : memref<1x6x8x128xf32, #tpu.memory_space<vmem>>, vector<1x1x8x128xf32>
    %47 = vector.shape_cast %46 : vector<1x1x8x128xf32> to vector<8x128xf32>
    %48 = vector.shape_cast %45 : vector<8x128xf32> to vector<1x1x8x128xf32>
    tpu.vector_store %arg4[%c0_40, %c4_41, %c0_42, %c0_43], %48 {strides = array<i32>} : memref<1x6x8x128xf32, #tpu.memory_space<vmem>>, vector<1x1x8x128xf32>,
    %c0_44 = arith.constant 0 : index
    %c5 = arith.constant 5 : index
    %c0_45 = arith.constant 0 : index
    %c0_46 = arith.constant 0 : index
    %49 = vector.load %arg4[%c0_44, %c5, %c0_45, %c0_46] : memref<1x6x8x128xf32, #tpu.memory_space<vmem>>, vector<1x1x8x128xf32>
    %50 = vector.shape_cast %49 : vector<1x1x8x128xf32> to vector<8x128xf32>
    %51 = arith.mulf %5, %5 : vector<16x128xf32>
    %52 = vector.shape_cast %51 : vector<16x128xf32> to vector<2x8x128xf32>
    %cst_47 = arith.constant dense<0.000000e+00> : vector<8x128xf32>
    %53 = vector.multi_reduction <add>, %52, %cst_47 [0] : vector<2x8x128xf32> to vector<8x128xf32>
    %54 = arith.addf %50, %53 : vector<8x128xf32>
    %c0_48 = arith.constant 0 : index
    %c5_49 = arith.constant 5 : index
    %c0_50 = arith.constant 0 : index
    %c0_51 = arith.constant 0 : index
    %55 = vector.load %arg4[%c0_48, %c5_49, %c0_50, %c0_51] : memref<1x6x8x128xf32, #tpu.memory_space<vmem>>, vector<1x1x8x128xf32>
    %56 = vector.shape_cast %55 : vector<1x1x8x128xf32> to vector<8x128xf32>
    %57 = vector.shape_cast %54 : vector<8x128xf32> to vector<1x1x8x128xf32>
    tpu.vector_store %arg4[%c0_48, %c5_49, %c0_50, %c0_51], %57 {strides = array<i32>} : memref<1x6x8x128xf32, #tpu.memory_space<vmem>>, vector<1x1x8x128xf32>,
    return
  }
  func.func @transform_0(%arg0: i32, %arg1: i32) -> (i32, i32) {
    %c1_i32 = arith.constant 1 : i32
    %0 = arith.muli %arg0, %c1_i32 : i32
    %1 = arith.addi %0, %arg1 : i32
    %c0_i32 = arith.constant 0 : i32
    %c0_i32_0 = arith.constant 0 : i32
    return %1, %c0_i32 : i32, i32
  }
  func.func @transform_1(%arg0: i32, %arg1: i32) -> (i32, i32) {
    %c1_i32 = arith.constant 1 : i32
    %0 = arith.muli %arg0, %c1_i32 : i32
    %1 = arith.addi %0, %arg1 : i32
    %c0_i32 = arith.constant 0 : i32
    %c0_i32_0 = arith.constant 0 : i32
    return %1, %c0_i32 : i32, i32
  }
  func.func @transform_2(%arg0: i32, %arg1: i32) -> (i32, i32, i32, i32) {
    %c0_i32 = arith.constant 0 : i32
    %c0_i32_0 = arith.constant 0 : i32
    %c0_i32_1 = arith.constant 0 : i32
    %c0_i32_2 = arith.constant 0 : i32
    return %arg0, %c0_i32, %c0_i32_0, %c0_i32_1 : i32, i32, i32, i32
  }
}

module attributes {stable_mosaic.version = 11 : i64} {
  func.func @kernel(%arg0: i32, %arg1: i32, %arg2: memref<1xf32, #tpu.memory_space<smem>>, %arg3: memref<16x128xf32, #tpu.memory_space<vmem>>, %arg4: memref<16x128xf32, #tpu.memory_space<vmem>>, %arg5: memref<1x8x128xf32, #tpu.memory_space<vmem>>) attributes {dimension_semantics = [#tpu.dimension_semantics<parallel>, #tpu.dimension_semantics<arbitrary>], iteration_bounds = array<i64: 2, 1>, scalar_prefetch = 0 : i64, scratch_operands = 0 : i64, tpu.core_type = #tpu.core_type<tc>, window_params = [{transform_indices = @transform_0, window_bounds = array<i64: 1>}, {transform_indices = @transform_1, window_bounds = array<i64: 16, 128>}, {transform_indices = @transform_2, window_bounds = array<i64: 16, 128>}, {transform_indices = @transform_3, window_bounds = array<i64: 1, 8, 128>}]} {
    %c0_i32 = arith.constant 0 : i32
    %0 = arith.cmpi eq, %arg1, %c0_i32 : i32
    %1 = arith.extui %0 : i1 to i32
    %c0_i32_0 = arith.constant 0 : i32
    %2 = arith.cmpi ne, %1, %c0_i32_0 : i32
    scf.if %2 {
      %cst_15 = arith.constant 0.000000e+00 : f32
      %26 = vector.broadcast %cst_15 : f32 to vector<8x128xf32>
      %c0_16 = arith.constant 0 : index
      %c0_17 = arith.constant 0 : index
      %c0_18 = arith.constant 0 : index
      %27 = vector.load %arg5[%c0_16, %c0_17, %c0_18] : memref<1x8x128xf32, #tpu.memory_space<vmem>>, vector<1x8x128xf32>
      %28 = vector.shape_cast %27 : vector<1x8x128xf32> to vector<8x128xf32>
      %29 = vector.shape_cast %26 : vector<8x128xf32> to vector<1x8x128xf32>
      tpu.vector_store %arg5[%c0_16, %c0_17, %c0_18], %29 {strides = array<i32>} : memref<1x8x128xf32, #tpu.memory_space<vmem>>, vector<1x8x128xf32>,
    } else {
    }
    %c0 = arith.constant 0 : index
    %3 = memref.load %arg2[%c0] : memref<1xf32, #tpu.memory_space<smem>>
    %c0_1 = arith.constant 0 : index
    %c0_2 = arith.constant 0 : index
    %4 = vector.load %arg3[%c0_1, %c0_2] : memref<16x128xf32, #tpu.memory_space<vmem>>, vector<16x128xf32>
    %5 = vector.broadcast %3 : f32 to vector<16x128xf32>
    %6 = arith.mulf %4, %5 : vector<16x128xf32>
    %cst = arith.constant 0.000000e+00 : f32
    %cst_3 = arith.constant 1.000000e+00 : f32
    %7 = vector.broadcast %cst : f32 to vector<16x128xf32>
    %8 = arith.maximumf %7, %6 : vector<16x128xf32>
    %9 = vector.broadcast %cst_3 : f32 to vector<16x128xf32>
    %10 = arith.minimumf %9, %8 : vector<16x128xf32>
    %c0_4 = arith.constant 0 : index
    %c0_5 = arith.constant 0 : index
    %11 = vector.load %arg4[%c0_4, %c0_5] : memref<16x128xf32, #tpu.memory_space<vmem>>, vector<16x128xf32>
    %cst_6 = arith.constant 0.454545468 : f32
    %12 = vector.broadcast %cst_6 : f32 to vector<16x128xf32>
    %13 = math.powf %10, %12 : vector<16x128xf32>
    %cst_7 = arith.constant 0.454545468 : f32
    %14 = vector.broadcast %cst_7 : f32 to vector<16x128xf32>
    %15 = math.powf %11, %14 : vector<16x128xf32>
    %16 = arith.subf %13, %15 : vector<16x128xf32>
    %c0_8 = arith.constant 0 : index
    %c0_9 = arith.constant 0 : index
    %c0_10 = arith.constant 0 : index
    %17 = vector.load %arg5[%c0_8, %c0_9, %c0_10] : memref<1x8x128xf32, #tpu.memory_space<vmem>>, vector<1x8x128xf32>
    %18 = vector.shape_cast %17 : vector<1x8x128xf32> to vector<8x128xf32>
    %19 = arith.mulf %16, %16 : vector<16x128xf32>
    %20 = vector.shape_cast %19 : vector<16x128xf32> to vector<2x8x128xf32>
    %cst_11 = arith.constant dense<0.000000e+00> : vector<8x128xf32>
    %21 = vector.multi_reduction <add>, %20, %cst_11 [0] : vector<2x8x128xf32> to vector<8x128xf32>
    %22 = arith.addf %18, %21 : vector<8x128xf32>
    %c0_12 = arith.constant 0 : index
    %c0_13 = arith.constant 0 : index
    %c0_14 = arith.constant 0 : index
    %23 = vector.load %arg5[%c0_12, %c0_13, %c0_14] : memref<1x8x128xf32, #tpu.memory_space<vmem>>, vector<1x8x128xf32>
    %24 = vector.shape_cast %23 : vector<1x8x128xf32> to vector<8x128xf32>
    %25 = vector.shape_cast %22 : vector<8x128xf32> to vector<1x8x128xf32>
    tpu.vector_store %arg5[%c0_12, %c0_13, %c0_14], %25 {strides = array<i32>} : memref<1x8x128xf32, #tpu.memory_space<vmem>>, vector<1x8x128xf32>,
    return
  }
  func.func @transform_0(%arg0: i32, %arg1: i32) -> i32 {
    %c0_i32 = arith.constant 0 : i32
    %c0_i32_0 = arith.constant 0 : i32
    return %c0_i32 : i32
  }
  func.func @transform_1(%arg0: i32, %arg1: i32) -> (i32, i32) {
    %c1_i32 = arith.constant 1 : i32
    %0 = arith.muli %arg0, %c1_i32 : i32
    %1 = arith.addi %0, %arg1 : i32
    %c0_i32 = arith.constant 0 : i32
    %c0_i32_0 = arith.constant 0 : i32
    return %1, %c0_i32 : i32, i32
  }
  func.func @transform_2(%arg0: i32, %arg1: i32) -> (i32, i32) {
    %c1_i32 = arith.constant 1 : i32
    %0 = arith.muli %arg0, %c1_i32 : i32
    %1 = arith.addi %0, %arg1 : i32
    %c0_i32 = arith.constant 0 : i32
    %c0_i32_0 = arith.constant 0 : i32
    return %1, %c0_i32 : i32, i32
  }
  func.func @transform_3(%arg0: i32, %arg1: i32) -> (i32, i32, i32) {
    %c0_i32 = arith.constant 0 : i32
    %c0_i32_0 = arith.constant 0 : i32
    %c0_i32_1 = arith.constant 0 : i32
    return %arg0, %c0_i32, %c0_i32_0 : i32, i32, i32
  }
}

module attributes {stable_mosaic.version = 11 : i64} {
  func.func @kernel(%arg0: i32, %arg1: memref<4x16x16xf32, #tpu.memory_space<vmem>>, %arg2: memref<4x16x16xf32, #tpu.memory_space<vmem>>, %arg3: memref<6x16xbf16, #tpu.memory_space<vmem>>, %arg4: memref<16x6xbf16, #tpu.memory_space<vmem>>, %arg5: memref<1x8x128xf32, #tpu.memory_space<vmem>>) attributes {dimension_semantics = [#tpu.dimension_semantics<parallel>], iteration_bounds = array<i64: 2>, scalar_prefetch = 0 : i64, scratch_operands = 0 : i64, tpu.core_type = #tpu.core_type<tc>, window_params = [{transform_indices = @transform_0, window_bounds = array<i64: 4, 16, 16>}, {transform_indices = @transform_1, window_bounds = array<i64: 4, 16, 16>}, {pipeline_mode = #tpu.pipeline_mode<synchronous>, transform_indices = @transform_2, window_bounds = array<i64: 6, 16>}, {pipeline_mode = #tpu.pipeline_mode<synchronous>, transform_indices = @transform_3, window_bounds = array<i64: 16, 6>}, {transform_indices = @transform_4, window_bounds = array<i64: 1, 8, 128>}]} {
    %c0 = arith.constant 0 : index
    %c0_0 = arith.constant 0 : index
    %0 = vector.load %arg3[%c0, %c0_0] : memref<6x16xbf16, #tpu.memory_space<vmem>>, vector<6x16xbf16>
    %c0_1 = arith.constant 0 : index
    %c0_2 = arith.constant 0 : index
    %1 = vector.load %arg4[%c0_1, %c0_2] : memref<16x6xbf16, #tpu.memory_space<vmem>>, vector<16x6xbf16>
    %cst = arith.constant 0.000000e+00 : f32
    %c0_i32 = arith.constant 0 : i32
    %c4_i32 = arith.constant 4 : i32
    %2 = arith.addi %c0_i32, %c4_i32 : i32
    %c1_i32 = arith.constant 1 : i32
    %3 = scf.for %arg6 = %c0_i32 to %2 step %c1_i32 iter_args(%arg7 = %cst) -> (f32)  : i32 {
      %6 = arith.index_cast %arg6 : i32 to index
      %c0_7 = arith.constant 0 : index
      %c0_8 = arith.constant 0 : index
      %7 = vector.load %arg1[%6, %c0_7, %c0_8] : memref<4x16x16xf32, #tpu.memory_space<vmem>>, vector<1x16x16xf32>
      %8 = vector.shape_cast %7 : vector<1x16x16xf32> to vector<16x16xf32>
      %9 = arith.index_cast %arg6 : i32 to index
      %c0_9 = arith.constant 0 : index
      %c0_10 = arith.constant 0 : index
      %10 = vector.load %arg2[%9, %c0_9, %c0_10] : memref<4x16x16xf32, #tpu.memory_space<vmem>>, vector<1x16x16xf32>
      %11 = vector.shape_cast %10 : vector<1x16x16xf32> to vector<16x16xf32>
      %12 = arith.mulf %8, %8 : vector<16x16xf32>
      %13 = arith.mulf %11, %11 : vector<16x16xf32>
      %14 = arith.mulf %8, %11 : vector<16x16xf32>
      %15 = tpu.concatenate %8, %11, %12, %13, %14 in 0 : vector<16x16xf32>, vector<16x16xf32>, vector<16x16xf32>, vector<16x16xf32>, vector<16x16xf32> -> vector<80x16xf32>
      %16 = arith.truncf %15 : vector<80x16xf32> to vector<80x16xbf16>
      %cst_11 = arith.constant dense<0.000000e+00> : vector<80x6xf32>
      %17 = tpu.matmul %16, %1, %cst_11 {dimension_numbers = #tpu.dot_dimension_numbers<[1], [0], [0], [1], [0, 0, 1, 1], [], []>} : vector<80x16xbf16>, vector<16x6xbf16>, vector<80x6xf32> -> vector<80x6xf32>
      %18 = arith.truncf %17 : vector<80x6xf32> to vector<80x6xbf16>
      %19 = vector.extract_strided_slice %18 {offsets = [0, 0], sizes = [16, 6], strides = [1, 1]} : vector<80x6xbf16> to vector<16x6xbf16>
      %cst_12 = arith.constant dense<0.000000e+00> : vector<6x6xf32>
      %20 = tpu.matmul %0, %19, %cst_12 {dimension_numbers = #tpu.dot_dimension_numbers<[1], [0], [0], [1], [0, 0, 1, 1], [], []>} : vector<6x16xbf16>, vector<16x6xbf16>, vector<6x6xf32> -> vector<6x6xf32>
      %21 = vector.extract_strided_slice %18 {offsets = [16, 0], sizes = [16, 6], strides = [1, 1]} : vector<80x6xbf16> to vector<16x6xbf16>
      %cst_13 = arith.constant dense<0.000000e+00> : vector<6x6xf32>
      %22 = tpu.matmul %0, %21, %cst_13 {dimension_numbers = #tpu.dot_dimension_numbers<[1], [0], [0], [1], [0, 0, 1, 1], [], []>} : vector<6x16xbf16>, vector<16x6xbf16>, vector<6x6xf32> -> vector<6x6xf32>
      %23 = vector.extract_strided_slice %18 {offsets = [32, 0], sizes = [16, 6], strides = [1, 1]} : vector<80x6xbf16> to vector<16x6xbf16>
      %cst_14 = arith.constant dense<0.000000e+00> : vector<6x6xf32>
      %24 = tpu.matmul %0, %23, %cst_14 {dimension_numbers = #tpu.dot_dimension_numbers<[1], [0], [0], [1], [0, 0, 1, 1], [], []>} : vector<6x16xbf16>, vector<16x6xbf16>, vector<6x6xf32> -> vector<6x6xf32>
      %25 = vector.extract_strided_slice %18 {offsets = [48, 0], sizes = [16, 6], strides = [1, 1]} : vector<80x6xbf16> to vector<16x6xbf16>
      %cst_15 = arith.constant dense<0.000000e+00> : vector<6x6xf32>
      %26 = tpu.matmul %0, %25, %cst_15 {dimension_numbers = #tpu.dot_dimension_numbers<[1], [0], [0], [1], [0, 0, 1, 1], [], []>} : vector<6x16xbf16>, vector<16x6xbf16>, vector<6x6xf32> -> vector<6x6xf32>
      %27 = vector.extract_strided_slice %18 {offsets = [64, 0], sizes = [16, 6], strides = [1, 1]} : vector<80x6xbf16> to vector<16x6xbf16>
      %cst_16 = arith.constant dense<0.000000e+00> : vector<6x6xf32>
      %28 = tpu.matmul %0, %27, %cst_16 {dimension_numbers = #tpu.dot_dimension_numbers<[1], [0], [0], [1], [0, 0, 1, 1], [], []>} : vector<6x16xbf16>, vector<16x6xbf16>, vector<6x6xf32> -> vector<6x6xf32>
      %29 = arith.mulf %20, %20 : vector<6x6xf32>
      %30 = arith.subf %24, %29 : vector<6x6xf32>
      %31 = arith.mulf %22, %22 : vector<6x6xf32>
      %32 = arith.subf %26, %31 : vector<6x6xf32>
      %33 = arith.mulf %20, %22 : vector<6x6xf32>
      %34 = arith.subf %28, %33 : vector<6x6xf32>
      %cst_17 = arith.constant 2.000000e+00 : f32
      %35 = vector.broadcast %cst_17 : f32 to vector<6x6xf32>
      %36 = arith.mulf %35, %20 : vector<6x6xf32>
      %37 = arith.mulf %36, %22 : vector<6x6xf32>
      %cst_18 = arith.constant 9.99999974E-5 : f32
      %38 = vector.broadcast %cst_18 : f32 to vector<6x6xf32>
      %39 = arith.addf %37, %38 : vector<6x6xf32>
      %cst_19 = arith.constant 2.000000e+00 : f32
      %40 = vector.broadcast %cst_19 : f32 to vector<6x6xf32>
      %41 = arith.mulf %40, %34 : vector<6x6xf32>
      %cst_20 = arith.constant 8.99999984E-4 : f32
      %42 = vector.broadcast %cst_20 : f32 to vector<6x6xf32>
      %43 = arith.addf %41, %42 : vector<6x6xf32>
      %44 = arith.mulf %39, %43 : vector<6x6xf32>
      %45 = arith.mulf %20, %20 : vector<6x6xf32>
      %46 = arith.mulf %22, %22 : vector<6x6xf32>
      %47 = arith.addf %45, %46 : vector<6x6xf32>
      %cst_21 = arith.constant 9.99999974E-5 : f32
      %48 = vector.broadcast %cst_21 : f32 to vector<6x6xf32>
      %49 = arith.addf %47, %48 : vector<6x6xf32>
      %50 = arith.addf %30, %32 : vector<6x6xf32>
      %cst_22 = arith.constant 8.99999984E-4 : f32
      %51 = vector.broadcast %cst_22 : f32 to vector<6x6xf32>
      %52 = arith.addf %50, %51 : vector<6x6xf32>
      %53 = arith.mulf %49, %52 : vector<6x6xf32>
      %54 = tpu.reciprocal %53 {approx = true} : vector<6x6xf32> -> vector<6x6xf32>
      %55 = arith.mulf %44, %54 : vector<6x6xf32>
      %56 = vector.shape_cast %55 : vector<6x6xf32> to vector<1x6x6xf32>
      %cst_23 = arith.constant dense<0.000000e+00> : vector<1xf32>
      %57 = vector.multi_reduction <add>, %56, %cst_23 [1, 2] : vector<1x6x6xf32> to vector<1xf32>
      %58 = vector.shape_cast %57 : vector<1xf32> to vector<1x1x1xf32>
      %59 = vector.extract %58[0, 0, 0] : f32 from vector<1x1x1xf32>
      %60 = arith.addf %arg7, %59 : f32
      scf.yield %60 : f32
    }
    %c4_i32_3 = arith.constant 4 : i32
    %4 = vector.broadcast %3 : f32 to vector<1x8x128xf32>
    %c0_4 = arith.constant 0 : index
    %c0_5 = arith.constant 0 : index
    %c0_6 = arith.constant 0 : index
    %5 = vector.load %arg5[%c0_4, %c0_5, %c0_6] : memref<1x8x128xf32, #tpu.memory_space<vmem>>, vector<1x8x128xf32>
    tpu.vector_store %arg5[%c0_4, %c0_5, %c0_6], %4 {strides = array<i32>} : memref<1x8x128xf32, #tpu.memory_space<vmem>>, vector<1x8x128xf32>,
    return
  }
  func.func @transform_0(%arg0: i32) -> (i32, i32, i32) {
    %c0_i32 = arith.constant 0 : i32
    %c0_i32_0 = arith.constant 0 : i32
    %c0_i32_1 = arith.constant 0 : i32
    return %arg0, %c0_i32, %c0_i32_0 : i32, i32, i32
  }
  func.func @transform_1(%arg0: i32) -> (i32, i32, i32) {
    %c0_i32 = arith.constant 0 : i32
    %c0_i32_0 = arith.constant 0 : i32
    %c0_i32_1 = arith.constant 0 : i32
    return %arg0, %c0_i32, %c0_i32_0 : i32, i32, i32
  }
  func.func @transform_2(%arg0: i32) -> (i32, i32) {
    %c0_i32 = arith.constant 0 : i32
    %c0_i32_0 = arith.constant 0 : i32
    %c0_i32_1 = arith.constant 0 : i32
    return %c0_i32, %c0_i32_0 : i32, i32
  }
  func.func @transform_3(%arg0: i32) -> (i32, i32) {
    %c0_i32 = arith.constant 0 : i32
    %c0_i32_0 = arith.constant 0 : i32
    %c0_i32_1 = arith.constant 0 : i32
    return %c0_i32, %c0_i32_0 : i32, i32
  }
  func.func @transform_4(%arg0: i32) -> (i32, i32, i32) {
    %c0_i32 = arith.constant 0 : i32
    %c0_i32_0 = arith.constant 0 : i32
    %c0_i32_1 = arith.constant 0 : i32
    return %arg0, %c0_i32, %c0_i32_0 : i32, i32, i32
  }
}

</mosaic_0001>

<bundles_post_ra>
// kernel: _compute_all.3
= control target key start
LH: loop header
LB: loop body
LE: loop exit
PB: predicated region body
PF: predicated region fallthrough
CT: control target
= control target key end

     0   :  { %s409_s9 = smov 0   ;;  %s411_s10 = smov 0   ;;  %s445_s0 = inlined_call_operand.vmem [shape: f32[32,128], index: 0, kind: input, shape index: {}]   ;;  %s446_s1 = inlined_call_operand.vmem [shape: f32[32,128], index: 1, kind: input, shape index: {}]   ;;  %s447_s2 = inlined_call_operand.vmem [shape: f32[2,6,8,128], index: 2, kind: output, shape index: {}]  }
   0x1   :  { %s413_s11 = smov 0  }
   0x2 LB: > { %s24_s12 = sadd.s32 1, %s388_s10  ;;  %p326_p0 = scmp.ge.s32.totalorder %s392_s11, 1  ;;  %s392_s11 = sphi %s413_s11, %s12_s11   ;;  %s388_s10 = sphi %s411_s10, %s449_s10   ;;  %s384_s9 = sphi %s409_s9, %s448_s9  }
   0x3   : > { %p26_p1 = scmp.ge.s32.totalorder %s24_s12, 2  ;;  %p144_p2 = scmp.lt.s32.totalorder %s392_s11, 3 }
   0x5   : > { %s451_s12 = smov (%p26_p1, %s24_s12), 0  ;;  %p145_p3 = pnand %p326_p0, %p144_p2 }
   0x6   : > { %p189_p4 = scmp.lt.s32.totalorder (!%p145_p3), %s384_s9, 1  ;;  %s327_s13 = sshll.u32 (!%p145_p3), %s384_s9, 1 }
   0x7   : > { %148 = sbr.rel (%p145_p3) target bundleno = 25 (0x19), region = 28  ;;  %p175_p5 = scmp.lt.s32.totalorder (!%p145_p3), %s327_s13, 3 }
   0xc   : > { %s453_s9 = smov (!%p189_p4, %s384_s9), 1  ;;  %s455_s13 = smov (!%p175_p5, %s327_s13), 3 }
   0xd   : > { %s344_s14 = smul.u32 48, %s453_s9  ;;  %s328_s15 = sshll.u32 %s455_s13, 3 }
   0xe   : > { %s178_s18 = scalar_lea.vmem %s445_s0, %s328_s15  ;;  %s186_s21 = scalar_lea.vmem %s446_s1, %s328_s15 }
   0xf   : > { %v204_v0 = vld [vmem:[%s178_s18] sm:$0xff]  ;;  %v205_v1 = vld [vmem:[%s178_s18 + $0x8] sm:$0xff]  ;;  %s193_s24 = scalar_lea.vmem %s447_s2, %s344_s14 }
  0x10   : > { %v211_v2 = vadd.f32 %v205_v1, %v204_v0  ;;  %v206_v3 = vld [vmem:[%s186_s21] sm:$0xff]  ;;  %v207_v4 = vld [vmem:[%s186_s21 + $0x8] sm:$0xff]  ;;  %v221_v5 = vmul.f32 %v204_v0, %v204_v0  ;;  %v222_v6 = vmul.f32 %v205_v1, %v205_v1 }
  0x11   : > { %v216_v7 = vadd.f32 %v207_v4, %v206_v3  ;;  %v228_v8 = vmul.f32 %v206_v3, %v206_v3  ;;  %v229_v9 = vmul.f32 %v207_v4, %v207_v4  ;;  %v235_v10 = vmul.f32 %v206_v3, %v204_v0 }
  0x12   : > { %v223_v11 = vadd.f32 %v222_v6, %v221_v5  ;;  %v236_v12 = vmul.f32 %v207_v4, %v205_v1  ;;  %v208_v13 = vsub.f32 %v204_v0, %v206_v3  ;;  %v209_v15 = vsub.f32 %v205_v1, %v207_v4  ;;  %213 = vst [vmem:[%s193_s24] sm:$0xff] %v211_v2 }
  0x13   : > { %v230_v14 = vadd.f32 %v229_v9, %v228_v8  ;;  %333 = vst [vmem:[%s193_s24 + $0x8] sm:$0xff] %v216_v7 }
  0x14   : > { %v237_v16 = vadd.f32 %v236_v12, %v235_v10  ;;  %v242_v17 = vmul.f32 %v208_v13, %v208_v13  ;;  %v243_v18 = vmul.f32 %v209_v15, %v209_v15  ;;  %335 = vst [vmem:[%s193_s24 + $0x10] sm:$0xff] %v223_v11 }
  0x15   : > { %337 = vst [vmem:[%s193_s24 + $0x18] sm:$0xff] %v230_v14 }
  0x16   : > { %v244_v19 = vadd.f32 %v243_v18, %v242_v17  ;;  %339 = vst [vmem:[%s193_s24 + $0x20] sm:$0xff] %v237_v16 }
  0x18   : > { %341 = vst [vmem:[%s193_s24 + $0x28] sm:$0xff] %v244_v19 }
  0x19 PF: > { %s12_s11 = sadd.s32 1, %s392_s11   ;;  %s448_s9 = smov %s388_s10 }
  0x1a   : > { %p9_p6 = scmp.ge.s32.totalorder %s12_s11, 4   ;;  %s449_s10 = smov %s451_s12 }
  0x1c   :  { %11 = sbr.rel (!%p9_p6) target bundleno = 2 (0x2), region = 70 }

// kernel: _compute_all.4
= control target key start
LH: loop header
LB: loop body
LE: loop exit
PB: predicated region body
PF: predicated region fallthrough
CT: control target
= control target key end

     0   :  { %s698_s14 = smov 0   ;;  %s700_s15 = smov 0   ;;  %s891_s0 = inlined_call_operand.<no memory space> [shape: f32[1], index: 0, kind: input, shape index: {}]   ;;  %s892_s1 = inlined_call_operand.vmem [shape: f32[32,128], index: 1, kind: input, shape index: {}]   ;;  %s893_s2 = inlined_call_operand.vmem [shape: f32[32,128], index: 2, kind: input, shape index: {}]   ;;  %s894_s3 = inlined_call_operand.vmem [shape: f32[2,8,128], index: 3, kind: output, shape index: {}]  }
   0x1   :  { %8 = sst [smem:[#allocation2]] %s891_s0  ;;  %s702_s16 = smov 0  }
   0x2 LB: > { %s26_s0 = sadd.s32 1, %s669_s15  ;;  %p326_p0 = scmp.ge.s32.totalorder %s673_s16, 1  ;;  %s673_s16 = sphi %s702_s16, %s14_s16   ;;  %s669_s15 = sphi %s700_s15, %s896_s15   ;;  %s665_s14 = sphi %s698_s14, %s895_s14  }
   0x3   : > { %p28_p1 = scmp.ge.s32.totalorder %s26_s0, 2  ;;  %p170_p2 = scmp.lt.s32.totalorder %s673_s16, 3 }
   0x5   : > { %s898_s0 = smov (%p28_p1, %s26_s0), 0  ;;  %p171_p3 = pnand %p326_p0, %p170_p2 }
   0x6   : > { %s327_s17 = sshll.u32 (!%p171_p3), %s665_s14, 1  ;;  %s225_s18 = sld [smem:[#allocation2]] (!%p171_p3) }
   0x7   : > { %174 = sbr.rel (%p171_p3) target bundleno = 100 (0x64), region = 32  ;;  %p202_p4 = scmp.lt.s32.totalorder (!%p171_p3), %s327_s17, 3 }
   0x8   : > { %p216_p5 = scmp.lt.s32.totalorder (!%p171_p3), %s665_s14, 1 }
   0xc   : > { %s900_s17 = smov (!%p202_p4, %s327_s17), 3  ;;  %v228_v2 = vstv %s225_s18  ;;  %s902_s14 = smov (!%p216_p5, %s665_s14), 1 }
   0xd   : > { %s328_s19 = sshll.u32 %s900_s17, 3  ;;  %s331_s26 = sshll.u32 %s902_s14, 3 }
   0xe   : > { %s205_s22 = scalar_lea.vmem %s892_s1, %s328_s19  ;;  %s213_s25 = scalar_lea.vmem %s893_s2, %s328_s19 }
   0xf   : > { %v226_v0 = vld [vmem:[%s205_s22] sm:$0xff]  ;;  %v227_v1 = vld [vmem:[%s205_s22 + $0x8] sm:$0xff]  ;;  %s219_s29 = scalar_lea.vmem %s894_s3, %s331_s26 }
  0x10   : > { %v725_v3 = vld [vmem:[%s213_s25] sm:$0xff]  ;;  %v229_v4 = vmul.f32 %v228_v2, %v226_v0  ;;  %v230_v5 = vmul.f32 %v228_v2, %v227_v1  ;;  %v735_v12 = vld [vmem:[%s213_s25 + $0x8] sm:$0xff] }
  0x11   : > { %v728_v6 = vand.u32 2147483647, %v725_v3  ;;  %v744_v17 = vand.u32 2147483647, %v735_v12 }
  0x12   : > { %v231_v7 = vmax.f32 %v229_v4, 0.0  ;;  %v232_v8 = vmax.f32 %v230_v5, 0.0 }
  0x13   : > { %v486_v9 = vand.u32 8388607, %v728_v6  ;;  %v557_v23 = vand.u32 8388607, %v744_v17  ;;  %v482_v26 = vand.u32 2139095040, %v728_v6  ;;  %v553_v36 = vand.u32 2139095040, %v744_v17 }
  0x14   : > { %v731_v10 = vmin.f32 %v231_v7, 1.0  ;;  %v733_v11 = vmin.f32 %v232_v8, 1.0  ;;  %vm520_vm10 = vweird.f32 %v728_v6  ;;  %vm519_vm13 = vcmp.lt.f32.partialorder %v728_v6, 0.0 }
  0x15   : > { %v487_v13 = vor.u32 8388608, %v486_v9  ;;  %v558_v31 = vor.u32 8388608, %v557_v23  ;;  %v483_v34 = vshrl.u32 %v482_v26, 23  ;;  %v554_v47 = vshrl.u32 %v553_v36, 23 }
  0x16   : > { %v738_v14 = vand.u32 2147483647, %v731_v10  ;;  %v741_v15 = vand.u32 2147483647, %v733_v11  ;;  %vm518_vm14 = vcmp.eq.f32.partialorder %v728_v6, 0.0  ;;  %vm517_vm15 = vcmp.eq.f32.partialorder %v728_v6, 1.0 }
  0x17   : > { %v489_v16 = vand.u32 8388607, %v487_v13  ;;  %v560_v42 = vand.u32 8388607, %v558_v31  ;;  %v545_v46 = vadd.s32 4294967169, %v483_v34 }
  0x18   : > { %v344_v18 = vand.u32 8388607, %v738_v14  ;;  %v415_v19 = vand.u32 8388607, %v741_v15  ;;  %v340_v37 = vand.u32 2139095040, %v738_v14  ;;  %v411_v41 = vand.u32 2139095040, %v741_v15 }
  0x19   : > { %v748_v20 = vor.u32 1065353216, %v489_v16  ;;  %v786_v55 = vor.u32 1065353216, %v560_v42  ;;  %vm377_vm4 = vcmp.lt.f32.partialorder %v738_v14, 0.0  ;;  %vm376_vm5 = vcmp.eq.f32.partialorder %v738_v14, 0.0 }
  0x1a   : > { %v345_v21 = vor.u32 8388608, %v344_v18  ;;  %v416_v22 = vor.u32 8388608, %v415_v19  ;;  %v341_v48 = vshrl.u32 %v340_v37, 23  ;;  %v412_v54 = vshrl.u32 %v411_v41, 23 }
  0x1b   : > { %vm491_vm0 = vcmp.ge.f32.partialorder %v748_v20, 1.4142135  ;;  %v492_v27 = vmul.f32 0.5, %v748_v20  ;;  %vm562_vm3 = vcmp.ge.f32.partialorder %v786_v55, 1.4142135  ;;  %v563_v13 = vmul.f32 0.5, %v786_v55 }
  0x1c   : > { %v347_v24 = vand.u32 8388607, %v345_v21  ;;  %v418_v25 = vand.u32 8388607, %v416_v22  ;;  %v403_v62 = vadd.s32 4294967169, %v341_v48  ;;  %v474_v5 = vadd.s32 4294967169, %v412_v54 }
  0x1d   : > { %v493_v30 = vsel %vm491_vm0, %v492_v27, %v748_v20  ;;  %v564_v34 = vsel %vm562_vm3, %v563_v13, %v786_v55  ;;  %vm375_vm6 = vcmp.eq.f32.partialorder %v738_v14, 1.0  ;;  %vm378_vm7 = vweird.f32 %v738_v14 }
  0x1e   : > { %v754_v28 = vor.u32 1065353216, %v347_v24  ;;  %v756_v29 = vor.u32 1065353216, %v418_v25  ;;  %v765_v35 = vadd.f32 -1.0, %v493_v30  ;;  %v352_v21 = vadd.s32 1, %v403_v62 }
  0x1f   : > { %v494_v24 = vadd.s32 1, %v545_v46  ;;  %v423_v31 = vadd.s32 1, %v474_v5  ;;  %vm449_vm8 = vweird.f32 %v741_v15  ;;  %vm447_vm9 = vcmp.eq.f32.partialorder %v741_v15, 0.0 }
  0x20   : > { %vm349_vm1 = vcmp.ge.f32.partialorder %v754_v28, 1.4142135  ;;  %v350_v32 = vmul.f32 0.5, %v754_v28  ;;  %vm420_vm2 = vcmp.ge.f32.partialorder %v756_v29, 1.4142135  ;;  %v421_v33 = vmul.f32 0.5, %v756_v29 }
  0x21   : > { %v497_v44 = vmul.f32 %v765_v35, %v765_v35  ;;  %v495_v48 = vsel %vm491_vm0, %v494_v24, %v545_v46  ;;  %vm448_vm11 = vcmp.lt.f32.partialorder %v741_v15, 0.0  ;;  %vm446_vm12 = vcmp.eq.f32.partialorder %v741_v15, 1.0 }
  0x22   : > { %v351_v38 = vsel %vm349_vm1, %v350_v32, %v754_v28  ;;  %v422_v39 = vsel %vm420_vm2, %v421_v33, %v756_v29  ;;  %vm385_vm0 = vcmp.lt.f32.partialorder %v731_v10, 0 }
  0x23   : > { %v775_v40 = vadd.f32 -1.0, %v351_v38  ;;  %v778_v43 = vadd.f32 -1.0, %v422_v39  ;;  %v498_v50 = vmul.f32 0.12621109, %v497_v44  ;;  %v500_v51 = vmul.f32 -0.20706727, %v497_v44 }
  0x25   : > { %v355_v45 = vmul.f32 %v775_v40, %v775_v40  ;;  %v426_v49 = vmul.f32 %v778_v43, %v778_v43  ;;  %v499_v58 = vadd.f32 0.21545328, %v498_v50  ;;  %v501_v61 = vadd.f32 -0.23896284, %v500_v51 }
  0x26   : > { %v795_v50 = vadd.s32 4294967169, %v554_v47 }
  0x27   : > { %v356_v52 = vmul.f32 0.12621109, %v355_v45  ;;  %v358_v53 = vmul.f32 -0.20706727, %v355_v45  ;;  %v427_v56 = vmul.f32 0.12621109, %v426_v49  ;;  %v502_v1 = vmul.f32 %v499_v58, %v497_v44 }
  0x28   : > { %v429_v57 = vmul.f32 -0.20706727, %v426_v49  ;;  %v504_v7 = vmul.f32 %v501_v61, %v497_v44 }
  0x29   : > { %v357_v59 = vadd.f32 0.21545328, %v356_v52  ;;  %v359_v60 = vadd.f32 -0.23896284, %v358_v53  ;;  %v428_v63 = vadd.f32 0.21545328, %v427_v56  ;;  %v353_v56 = vsel %vm349_vm1, %v352_v21, %v403_v62 }
  0x2a   : > { %v430_v0 = vadd.f32 -0.23896284, %v429_v57  ;;  %v503_v19 = vadd.f32 0.28795174, %v502_v1  ;;  %v505_v27 = vadd.f32 -0.3607037, %v504_v7  ;;  %v515_v62 = vcvt.s32.f32 %v495_v48 }
  0x2b   : > { %v360_v2 = vmul.f32 %v357_v59, %v355_v45  ;;  %v362_v4 = vmul.f32 %v359_v60, %v355_v45  ;;  %v431_v8 = vmul.f32 %v428_v63, %v426_v49  ;;  %v803_v59 = vadd.f32 -1.0, %v564_v34 }
  0x2c   : > { %v433_v9 = vmul.f32 %v430_v0, %v426_v49  ;;  %v506_v30 = vmul.f32 %v503_v19, %v497_v44  ;;  %v508_v39 = vmul.f32 %v505_v27, %v497_v44  ;;  %v373_v60 = vcvt.s32.f32 %v353_v56 }
  0x2d   : > { %v361_v16 = vadd.f32 0.28795174, %v360_v2  ;;  %v363_v18 = vadd.f32 -0.3607037, %v362_v4  ;;  %v432_v22 = vadd.f32 0.28795174, %v431_v8 }
  0x2e   : > { %v434_v23 = vadd.f32 -0.3607037, %v433_v9  ;;  %v507_v38 = vadd.f32 0.48090908, %v506_v30  ;;  %v509_v53 = vadd.f32 -0.72134733, %v508_v39 }
  0x2f   : > { %v364_v25 = vmul.f32 %v361_v16, %v355_v45  ;;  %v366_v26 = vmul.f32 %v363_v18, %v355_v45  ;;  %v435_v32 = vmul.f32 %v432_v22, %v426_v49  ;;  %v565_v19 = vadd.s32 1, %v795_v50 }
  0x30   : > { %v437_v33 = vmul.f32 %v434_v23, %v426_v49  ;;  %v510_v54 = vmul.f32 %v507_v38, %v497_v44  ;;  %v512_v47 = vmul.f32 %v765_v35, %v509_v53  ;;  %v568_v44 = vmul.f32 %v803_v59, %v803_v59 }
  0x31   : > { %v365_v36 = vadd.f32 0.48090908, %v364_v25  ;;  %v367_v37 = vadd.f32 -0.72134733, %v366_v26  ;;  %v436_v41 = vadd.f32 0.48090908, %v435_v32 }
  0x32   : > { %v438_v42 = vadd.f32 -0.72134733, %v437_v33  ;;  %v511_v46 = vadd.f32 1.442695, %v510_v54  ;;  %v569_v1 = vmul.f32 0.12621109, %v568_v44 }
  0x33   : > { %v368_v51 = vmul.f32 %v365_v36, %v355_v45  ;;  %v370_v52 = vmul.f32 %v775_v40, %v367_v37  ;;  %v439_v57 = vmul.f32 %v436_v41, %v426_v49  ;;  %v424_v45 = vsel %vm420_vm2, %v423_v31, %v474_v5 }
  0x34   : > { %v441_v58 = vmul.f32 %v778_v43, %v438_v42  ;;  %v513_v61 = vadd.f32 %v512_v47, %v511_v46  ;;  %v444_v0 = vcvt.s32.f32 %v424_v45  ;;  %v571_v29 = vmul.f32 -0.20706727, %v568_v44 }
  0x35   : > { %v369_v20 = vadd.f32 1.442695, %v368_v51  ;;  %v440_v28 = vadd.f32 1.442695, %v439_v57  ;;  %v570_v7 = vadd.f32 0.21545328, %v569_v1  ;;  %vm591_vm2 = vweird.f32 %v744_v17 }
  0x36   : > { %v514_v4 = vmul.f32 %v765_v35, %v513_v61  ;;  %v572_v8 = vadd.f32 -0.23896284, %v571_v29  ;;  %vm527_vm1 = vcmp.lt.f32.partialorder %v725_v3, 0 }
  0x37   : > { %v371_v49 = vadd.f32 %v370_v52, %v369_v20  ;;  %v442_v63 = vadd.f32 %v441_v58, %v440_v28  ;;  %v566_v52 = vsel %vm562_vm3, %v565_v19, %v795_v50  ;;  %vm590_vm3 = vcmp.lt.f32.partialorder %v744_v17, 0.0 }
  0x38   : > { %v516_v13 = vadd.f32 %v515_v62, %v514_v4  ;;  %v575_v18 = vmul.f32 %v572_v8, %v568_v44  ;;  %v586_v57 = vcvt.s32.f32 %v566_v52 }
  0x39   : > { %v372_v2 = vmul.f32 %v775_v40, %v371_v49  ;;  %v443_v5 = vmul.f32 %v778_v43, %v442_v63  ;;  %v573_v40 = vmul.f32 %v570_v7, %v568_v44 }
  0x3a   : > { %v521_v43 = vsel %vm520_vm10, %v728_v6, %v516_v13  ;;  %v576_v30 = vadd.f32 -0.3607037, %v575_v18  ;;  %vm532_vm10 = vcmp.eq.f32.partialorder %v728_v6, 2139095040 }
  0x3b   : > { %v374_v9 = vadd.f32 %v373_v60, %v372_v2  ;;  %v445_v16 = vadd.f32 %v444_v0, %v443_v5  ;;  %v522_v23 = vsel %vm519_vm13, nan, %v521_v43  ;;  %v574_v24 = vadd.f32 0.28795174, %v573_v40 }
  0x3c   : > { %v523_v27 = vsel %vm518_vm14, -inf, %v522_v23  ;;  %v579_v39 = vmul.f32 %v576_v30, %v568_v44  ;;  %vm540_vm13 = vcmp.ne.f32.partialorder %v725_v3, %v725_v3  ;;  %vm461_vm14 = vcmp.eq.f32.partialorder %v741_v15, 2139095040 }
  0x3d   : > { %v379_v35 = vsel %vm378_vm7, %v738_v14, %v374_v9  ;;  %v450_v22 = vsel %vm449_vm8, %v741_v15, %v445_v16  ;;  %v524_v33 = vsel %vm517_vm15, 0.0, %v523_v27  ;;  %v577_v34 = vmul.f32 %v574_v24, %v568_v44 }
  0x3e   : > { %v380_v21 = vsel %vm377_vm4, nan, %v379_v35  ;;  %v451_v26 = vsel %vm448_vm11, nan, %v450_v22  ;;  %v525_v38 = vmul.f32 0.45454547, %v524_v33  ;;  %v580_v42 = vadd.f32 -0.72134733, %v579_v39 }
  0x3f   : > { %v381_v25 = vsel %vm376_vm5, -inf, %v380_v21  ;;  %v452_v32 = vsel %vm447_vm9, -inf, %v451_v26  ;;  %v578_v41 = vadd.f32 0.48090908, %v577_v34  ;;  %vm386_vm4 = vcmp.eq.f32.partialorder %v731_v10, 0 }
  0x40   : > { %v382_v31 = vsel %vm375_vm6, 0.0, %v381_v25  ;;  %v453_v37 = vsel %vm446_vm12, 0.0, %v452_v32  ;;  %v583_v53 = vmul.f32 %v803_v59, %v580_v42  ;;  %vm528_vm5 = vcmp.eq.f32.partialorder %v725_v3, 0 }
  0x41   : > { %v383_v36 = vmul.f32 0.45454547, %v382_v31  ;;  %v454_v48 = vmul.f32 0.45454547, %v453_v37  ;;  %v581_v51 = vmul.f32 %v578_v41, %v568_v44  ;;  %vm589_vm6 = vcmp.eq.f32.partialorder %v744_v17, 0.0 }
  0x42   : > { %vm456_vm7 = vcmp.lt.f32.partialorder %v733_v11, 0  ;;  %vm588_vm8 = vcmp.eq.f32.partialorder %v744_v17, 1.0  ;;  %vm390_vm9 = vcmp.eq.f32.partialorder %v738_v14, 2139095040  ;;  %vm457_vm11 = vcmp.eq.f32.partialorder %v733_v11, 0 }
  0x43   : > { %643 = vpow2.f32 %v383_v36  ;;  %v582_v54 = vadd.f32 1.442695, %v581_v51  ;;  %vm398_vm12 = vcmp.ne.f32.partialorder %v731_v10, %v731_v10  ;;  %vm387_vm15 = vcmp.eq.f32.partialorder %v731_v10, 1065353216 }
  0x44   : > { %645 = vpow2.f32 %v525_v38 }
  0x45   : > { %647 = vpow2.f32 %v454_v48  ;;  %v584_v56 = vadd.f32 %v583_v53, %v582_v54 }
  0x47   : > { %v585_v20 = vmul.f32 %v803_v59, %v584_v56 }
  0x49   : > { %v644_v58 = vpop.eup %643  ;;  %v587_v55 = vadd.f32 %v586_v57, %v585_v20 }
  0x4a   : > { %v646_v45 = vpop.eup %645  ;;  %v391_v50 = vsel %vm385_vm0, 2143289344, %v644_v58  ;;  %vm529_vm0 = vcmp.eq.f32.partialorder %v725_v3, 1065353216 }
  0x4b   : > { %v533_v46 = vsel %vm527_vm1, 2143289344, %v646_v45  ;;  %v648_v47 = vpop.eup %647  ;;  %v592_v59 = vsel %vm591_vm2, %v744_v17, %v587_v55  ;;  %v392_v44 = vsel %vm386_vm4, 0, %v391_v50  ;;  %vm469_vm1 = vcmp.ne.f32.partialorder %v733_v11, %v733_v11 }
  0x4c   : > { %v593_v28 = vsel %vm590_vm3, nan, %v592_v59  ;;  %v534_v49 = vsel %vm528_vm5, 0, %v533_v46  ;;  %v462_v61 = vsel %vm456_vm7, 2143289344, %v648_v47  ;;  %v397_v0 = vsel %vm390_vm9, 2139095040, %v392_v44 }
  0x4d   : > { %v594_v60 = vsel %vm589_vm6, -inf, %v593_v28  ;;  %v539_v1 = vsel %vm532_vm10, 2139095040, %v534_v49  ;;  %v463_v14 = vsel %vm457_vm11, 0, %v462_v61  ;;  %v401_v6 = vsel %vm398_vm12, 2143289344, %v397_v0 }
  0x4e   : > { %v595_v62 = vsel %vm588_vm8, 0.0, %v594_v60  ;;  %v543_v29 = vsel %vm540_vm13, 2143289344, %v539_v1  ;;  %v468_v2 = vsel %vm461_vm14, 2139095040, %v463_v14  ;;  %vm598_vm2 = vcmp.lt.f32.partialorder %v735_v12, 0 }
  0x4f   : > { %v596_v63 = vmul.f32 0.45454547, %v595_v62  ;;  %v402_v4 = vsel %vm387_vm15, 1065353216, %v401_v6  ;;  %v544_v5 = vsel %vm529_vm0, 1065353216, %v543_v29  ;;  %vm599_vm4 = vcmp.eq.f32.partialorder %v735_v12, 0 }
  0x50   : > { %vm458_vm3 = vcmp.eq.f32.partialorder %v733_v11, 1065353216  ;;  %v472_v10 = vsel %vm469_vm1, 2143289344, %v468_v2  ;;  %vm603_vm5 = vcmp.eq.f32.partialorder %v744_v17, 2139095040  ;;  %vm611_vm6 = vcmp.ne.f32.partialorder %v735_v12, %v735_v12 }
  0x51   : > { %649 = vpow2.f32 %v596_v63  ;;  %vm600_vm7 = vcmp.eq.f32.partialorder %v735_v12, 1065353216  ;;  %v241_v8 = vsub.f32 %v402_v4, %v544_v5  ;;  %v473_v9 = vsel %vm458_vm3, 1065353216, %v472_v10 }
  0x53   : > { %v244_v35 = vmul.f32 %v241_v8, %v241_v8 }
  0x57   : > { %v650_v15 = vpop.eup %649 }
  0x58   : > { %v604_v3 = vsel %vm598_vm2, 2143289344, %v650_v15 }
  0x59   : > { %v605_v7 = vsel %vm599_vm4, 0, %v604_v3 }
  0x5a   : > { %v610_v13 = vsel %vm603_vm5, 2139095040, %v605_v7 }
  0x5b   : > { %v614_v16 = vsel %vm611_vm6, 2143289344, %v610_v13 }
  0x5c   : > { %v615_v40 = vsel %vm600_vm7, 1065353216, %v614_v16 }
  0x5d   : > { %v242_v18 = vsub.f32 %v473_v9, %v615_v40 }
  0x5f   : > { %v245_v11 = vmul.f32 %v242_v18, %v242_v18 }
  0x61   : > { %v246_v43 = vadd.f32 %v245_v11, %v244_v35 }
  0x63   : > { %248 = vst [vmem:[%s219_s29] sm:$0xff] %v246_v43 }
  0x64 PF: > { %s14_s16 = sadd.s32 1, %s673_s16   ;;  %s895_s14 = smov %s669_s15 }
  0x65   : > { %p11_p6 = scmp.ge.s32.totalorder %s14_s16, 4   ;;  %s896_s15 = smov %s898_s0 }
  0x67   :  { %13 = sbr.rel (!%p11_p6) target bundleno = 2 (0x2), region = 69 }

// kernel: _compute_all.5
= control target key start
LH: loop header
LB: loop body
LE: loop exit
PB: predicated region body
PF: predicated region fallthrough
CT: control target
= control target key end

     0   :  { %s639_s15 = smov 0   ;;  %s717_s0 = inlined_call_operand.vmem [shape: f32[8,16,16], index: 0, kind: input, shape index: {}]   ;;  %s718_s1 = inlined_call_operand.vmem [shape: f32[8,16,16], index: 1, kind: input, shape index: {}]   ;;  %s719_s2 = inlined_call_operand.vmem [shape: bf16[6,16], index: 2, kind: input, shape index: {}]   ;;  %s720_s3 = inlined_call_operand.vmem [shape: bf16[16,6], index: 3, kind: input, shape index: {}]   ;;  %s721_s4 = inlined_call_operand.vmem [shape: f32[2,8,128], index: 4, kind: output, shape index: {}]  }
   0x1 LB: > { %s529_s16 = sadd.s32 4294967295, %s604_s15   ;;  %p533_p0 = scmp.ge.s32.totalorder %s604_s15, 1  ;;  %s604_s15 = sphi %s639_s15, %s14_s15  }
   0x2   : > { %p176_p1 = scmp.lt.s32.totalorder %s604_s15, 3 }
   0x4   : > { %p177_p2 = pnand %p533_p0, %p176_p1 }
   0x5   : > { %s534_s17 = sshll.u32 (!%p177_p2), %s529_s16, 2  ;;  %p222_p3 = scmp.lt.s32.totalorder (!%p177_p2), %s529_s16, 1 }
   0x6   : > { %180 = sbr.rel (%p177_p2) target bundleno = 527 (0x20f), region = 36  ;;  %p209_p4 = scmp.lt.s32.totalorder (!%p177_p2), %s534_s17, 7 }
   0x7   : > { %s677_s9 = smov (!%p177_p2), 0.0   ;;  %s679_s10 = smov (!%p177_p2), 0  }
   0xb   : > { %v650_v0 = vld [vmem:[%s719_s2] sm:$0x7]  ;;  %v660_v2 = vld [vmem:[%s720_s3] sm:$0xf0]  ;;  %s724_s16 = smov (!%p222_p3, %s529_s16), 1  ;;  %s726_s17 = smov (!%p209_p4, %s534_s17), 7 }
   0xc   : > { %v655_v1 = vld [vmem:[%s720_s3] sm:$0xf]  ;;  %s540_s24 = sshll.u32 %s724_s16, 3  ;;  %s558_s25 = sshll.u32 %s726_s17, 4 }
   0xd   : > { %s665_s28 = scalar_lea.vmem %s721_s4, %s540_s24  ;;  %s670_s5 = scalar_lea.vmem %s717_s0, %s558_s25 }
   0xe   : > { %s675_s8 = scalar_lea.vmem %s718_s1, %s558_s25 }
   0xf LB: >> { %v545_v3 = vor.u32 %v660_v2, %v655_v1  ;;  %s541_s11 = sshll.u32 %s612_s10, 4  ;;  %vm261_vm0 = vcmask 130048   ;;  %vm438_vm1 = vcmask 46080   ;;  %s235_s10 = sadd.s32 1, %s612_s10   ;;  %s612_s10 = sphi %s679_s10, %s235_s10   ;;  %s608_s9 = sphi %s677_s9, %s722_s9  }
  0x10   : >> { %s238_s12 = scalar_lea.vmem %s670_s5, %s541_s11  ;;  %s241_s13 = scalar_lea.vmem %s675_s8, %s541_s11 }
  0x11   : >> { %284 = vmatpush.bf16.msra.mxu0 %v545_v3  ;;  %561 = vmatpush.bf16.msra.mxu3 %v545_v3  ;;  %v239_v4 = vld [vmem:[%s238_s12] sm:$0xff]  ;;  %v240_v5 = vld [vmem:[%s238_s12 + $0x8] sm:$0xff]  ;;  %p232_p5 = scmp.ge.s32.totalorder %s235_s10, 4  }
  0x12   : >> { %v242_v6 = vld [vmem:[%s241_s13] sm:$0xff]  ;;  %v250_v7 = vpack.c.bf16 %v240_v5, %v239_v4  ;;  %v243_v8 = vld [vmem:[%s241_s13 + $0x8] sm:$0xff]  ;;  %v244_v16 = vmul.f32 %v239_v4, %v239_v4  ;;  %v245_v17 = vmul.f32 %v240_v5, %v240_v5 }
  0x13   : >> { %v246_v9 = vmul.f32 %v242_v6, %v242_v6  ;;  %v247_v10 = vmul.f32 %v243_v8, %v243_v8  ;;  %v248_v12 = vmul.f32 %v242_v6, %v239_v4  ;;  %v249_v13 = vmul.f32 %v243_v8, %v240_v5 }
  0x14   : >> { %546 = vmatmul.msk.bf16.vlgmr.msra.gmra.mxu0 %vm261_vm0, %v250_v7  ;;  %v251_v14 = vpack.c.bf16 %v243_v8, %v242_v6  ;;  %v252_v18 = vpack.c.bf16 %v245_v17, %v244_v16 }
  0x15   : >> { %v253_v11 = vpack.c.bf16 %v247_v10, %v246_v9  ;;  %v254_v15 = vpack.c.bf16 %v249_v13, %v248_v12 }
  0x17   : >> { %549 = vmatmul.msk.bf16.vlgmr.msra.gmra.mxu3 %vm261_vm0, %v253_v11 }
  0x24   : >> { %547 = vmatmul.msk.bf16.gmra.mxu0 %vm261_vm0, %v251_v14 }
  0x27   : >> { %550 = vmatmul.msk.bf16.gmra.mxu3 %vm261_vm0, %v254_v15 }
  0x34   : >> { %548 = vmatmul.msk.bf16.gmra.mxu0 %vm261_vm0, %v252_v18 }
  0x91   : >> { %v286_v19 = vpop.f32.mrf.mxu0 }
  0x92   : >> { %v311_v20 = vpack.c.bf16 %v286_v19, %v286_v19 }
  0x94   : >> { %v323_v24 = vunpack.c.l.b16 %v311_v20 }
  0x99   : >> { %v288_v21 = vpop.f32.mrf.mxu0 }
  0x9a   : >> { %v312_v22 = vpack.c.bf16 %v288_v21, %v288_v21  ;;  %v301_v23 = vpop.f32.mrf.mxu3 }
  0x9b   : >> { %v317_v27 = vpack.c.bf16 %v301_v23, %v301_v23 }
  0x9c   : >> { %v324_v25 = vunpack.c.l.b16 %v312_v22 }
  0x9d   : >> { %v383_v30 = vunpack.c.l.b16 %v317_v27 }
  0x9e   : >> { %v325_v26 = vpack.c.b16 %v324_v25, %v323_v24 }
  0xa0   : >> { %337 = vmatpush.bf16.msra.mxu1 %v325_v26 }
  0xa1   : >> { %v291_v28 = vpop.f32.mrf.mxu0 }
  0xa2   : >> { %v303_v29 = vpop.f32.mrf.mxu3  ;;  %v313_v34 = vpack.c.bf16 %v291_v28, %v291_v28 }
  0xa3   : >> { %v318_v31 = vpack.c.bf16 %v303_v29, %v303_v29  ;;  %551 = vmatmul.msk.bf16.vlgmr.msra.gmra.mxu1 %vm261_vm0, %v650_v0 }
  0xa4   : >> { %v345_v38 = vunpack.c.l.b16 %v313_v34 }
  0xa5   : >> { %v384_v32 = vunpack.c.l.b16 %v318_v31 }
  0xa7   : >> { %v385_v33 = vpack.c.b16 %v384_v32, %v383_v30 }
  0xa9   : >> { %v293_v35 = vpop.f32.mrf.mxu0  ;;  %394 = vmatpush.bf16.msrb.mxu1 %v385_v33 }
  0xaa   : >> { %v314_v36 = vpack.c.bf16 %v293_v35, %v293_v35  ;;  %v306_v37 = vpop.f32.mrf.mxu3 }
  0xab   : >> { %v319_v41 = vpack.c.bf16 %v306_v37, %v306_v37 }
  0xac   : >> { %v346_v39 = vunpack.c.l.b16 %v314_v36 }
  0xad   : >> { %v402_v44 = vunpack.c.l.b16 %v319_v41 }
  0xae   : >> { %v347_v40 = vpack.c.b16 %v346_v39, %v345_v38 }
  0xb0   : >> { %356 = vmatpush.bf16.msra.mxu2 %v347_v40 }
  0xb1   : >> { %v296_v42 = vpop.f32.mrf.mxu0 }
  0xb2   : >> { %v308_v43 = vpop.f32.mrf.mxu3  ;;  %v315_v48 = vpack.c.bf16 %v296_v42, %v296_v42 }
  0xb3   : >> { %552 = vmatmul.msk.bf16.vlgmr.msra.gmra.mxu2 %vm261_vm0, %v650_v0  ;;  %v320_v45 = vpack.c.bf16 %v308_v43, %v308_v43  ;;  %554 = vmatmul.msk.bf16.vlgmr.msrb.gmra.mxu1 %vm261_vm0, %v650_v0 }
  0xb4   : >> { %v364_v51 = vunpack.c.l.b16 %v315_v48 }
  0xb5   : >> { %v403_v46 = vunpack.c.l.b16 %v320_v45 }
  0xb7   : >> { %v404_v47 = vpack.c.b16 %v403_v46, %v402_v44 }
  0xb9   : >> { %v298_v49 = vpop.f32.mrf.mxu0  ;;  %413 = vmatpush.bf16.msrb.mxu2 %v404_v47 }
  0xba   : >> { %v316_v50 = vpack.c.bf16 %v298_v49, %v298_v49 }
  0xbc   : >> { %v365_v52 = vunpack.c.l.b16 %v316_v50 }
  0xbe   : >> { %v366_v53 = vpack.c.b16 %v365_v52, %v364_v51 }
  0xc0   : >> { %375 = vmatpush.bf16.msrb.mxu3 %v366_v53 }
  0xc3   : >> { %553 = vmatmul.msk.bf16.vlgmr.msrb.gmra.mxu3 %vm261_vm0, %v650_v0  ;;  %555 = vmatmul.msk.bf16.vlgmr.msrb.gmra.mxu2 %vm261_vm0, %v650_v0 }
 0x120   : >> { %v339_v54 = vpop.f32.mrf.mxu1 }
 0x121   : >> { %v419_v60 = vmul.f32 %v339_v54, %v339_v54  ;;  %v425_v9 = vmul.f32 2.0, %v339_v54 }
 0x128   : >> { %v341_v55 = vpop.f32.mrf.mxu1 }
 0x130   : >> { %v396_v56 = vpop.f32.mrf.mxu1 }
 0x136   : >> { %v358_v57 = vpop.f32.mrf.mxu2 }
 0x137   : >> { %v421_v61 = vmul.f32 %v358_v57, %v358_v57  ;;  %v423_v3 = vmul.f32 %v358_v57, %v339_v54  ;;  %v426_v14 = vmul.f32 %v425_v9, %v358_v57 }
 0x138   : >> { %v398_v58 = vpop.f32.mrf.mxu1 }
 0x139   : >> { %v422_v5 = vsub.f32 %v396_v56, %v421_v61  ;;  %v431_v6 = vadd.f32 %v421_v61, %v419_v60  ;;  %v427_v18 = vadd.f32 0.0001, %v426_v14 }
 0x13b   : >> { %v432_v10 = vadd.f32 0.0001, %v431_v6 }
 0x13e   : >> { %v360_v59 = vpop.f32.mrf.mxu2 }
 0x146   : >> { %v377_v62 = vpop.f32.mrf.mxu3  ;;  %v415_v63 = vpop.f32.mrf.mxu2 }
 0x147   : >> { %v420_v4 = vsub.f32 %v377_v62, %v419_v60  ;;  %v424_v7 = vsub.f32 %v415_v63, %v423_v3 }
 0x149   : >> { %v433_v8 = vadd.f32 %v422_v5, %v420_v4  ;;  %v428_v12 = vmul.f32 2.0, %v424_v7 }
 0x14b   : >> { %v434_v11 = vadd.f32 0.0009, %v433_v8  ;;  %v429_v17 = vadd.f32 0.0009, %v428_v12 }
 0x14d   : >> { %v435_v13 = vmul.f32 %v434_v11, %v432_v10  ;;  %v430_v19 = vmul.f32 %v429_v17, %v427_v18 }
 0x14e   : >> { %v379_v15 = vpop.f32.mrf.mxu3  ;;  %v417_v16 = vpop.f32.mrf.mxu2 }
 0x14f   : >> { %588 = vrcp.f32 %v435_v13 }
 0x155   : >> { %v589_v20 = vpop.eup %588 }
 0x156   : >> { %v437_v21 = vmul.f32 %v589_v20, %v430_v19 }
 0x158   : >> { %v439_v22 = vsel %vm438_vm1, %v437_v21, 0.0 }
 0x159   : >> { %440 = vadd.xlane.f32.xlu0 %v439_v22 }
 0x1cc   : >> { %v441_v23 = vpop.xlane.xlu0 %440 }
 0x1cd   : >> { %v442_v24 = vrot.slane %v441_v23, 4 }
 0x1cf   : >> { %v443_v25 = vadd.f32 %v442_v24, %v441_v23 }
 0x1d1   : >> { %v444_v26 = vrot.slane %v443_v25, 2 }
 0x1d3   : >> { %v445_v27 = vadd.f32 %v444_v26, %v443_v25 }
 0x1d5   : >> { %v446_v28 = vrot.slane %v445_v27, 1 }
 0x1d7   : >> { %v447_v29 = vadd.f32 %v446_v28, %v445_v27 }
 0x1d9   : >> { %562 = vpush %v447_v29 }
 0x209   : > { %234 = sbr.rel (!%p232_p5) target bundleno = 15 (0xf), region = 78 }
 0x20a   : >> { %s563_s14 = spop %562 }
 0x20b   : >> { %s449_s16 = sadd.f32 %s608_s9, %s563_s14  }
 0x20d   : >> { %s722_s9 = smov %s449_s16  ;;  %v450_v30 = vstv (%p232_p5), %s449_s16 }
 0x20e   : > { %451 = vst [vmem:[%s665_s28] sm:$0xff] %v450_v30 }
 0x20f PF: > { %s14_s15 = sadd.s32 1, %s604_s15  }
 0x210   : > { %p11_p6 = scmp.ge.s32.totalorder %s14_s15, 4  }
 0x212   :  { %13 = sbr.rel (!%p11_p6) target bundleno = 1 (0x1), region = 89 }

</bundles_post_ra>
